<compile_context>
chip_gen: v7x
topology: tpu7x:2x2x1
jax: 0.10.0
libtpu: 0.0.40
codegen_flags: <defaults>
</compile_context>

<pallas_src>
import functools

import jax
import jax.numpy as jnp
from jax import lax
from jax.experimental import pallas as pl
from jax.experimental.pallas import tpu as pltpu


# -----------------------------------------------------------------------------
# Tiling helpers
# -----------------------------------------------------------------------------
def _round_up(n, m):
    return ((n + m - 1) // m) * m


def _tile_and_pad(n, cap, align):
    """Return (tile, padded_n) with tile | padded_n.

    n <= cap        -> full-dim block (always legal under the (8,128) rule).
    aligned divisor -> largest aligned divisor <= cap, no padding.
    otherwise       -> tile = aligned cap, n zero-padded up to a multiple of it
                       (exact: zero rows/cols contribute nothing, sliced off).
    """
    if n <= cap:
        return n, n
    t = (cap // align) * align
    while t >= align:
        if n % t == 0:
            return t, n
        t -= align
    t = (cap // align) * align
    return t, _round_up(n, t)


def _heads_per_block(num_heads, head_dim):
    """Smallest group of consecutive heads whose per-head-group slab width is a
    128-lane multiple (lane-dense blocks); falls back to all heads (full-dim
    blocks, always legal) for tiny configs."""
    for hg in range(1, num_heads + 1):
        if num_heads % hg == 0 and (hg * head_dim) % 128 == 0:
            return hg
    return num_heads


# -----------------------------------------------------------------------------
# Kernel 1: tiled dense linear  y = x @ Wt + b   (Wt pre-transposed, bf16)
# -----------------------------------------------------------------------------
def _linear_kernel(x_ref, w_ref, b_ref, o_ref, acc_ref):
    k = pl.program_id(2)

    @pl.when(k == 0)
    def _():
        acc_ref[...] = jnp.zeros_like(acc_ref)

    # bf16 MXU operands, f32 accumulation (w_ref already bf16; x cast here —
    # a no-op when the activation is already bf16).
    acc_ref[...] += jnp.dot(
        x_ref[...].astype(jnp.bfloat16),
        w_ref[...].astype(jnp.bfloat16),
        preferred_element_type=jnp.float32,
    )

    @pl.when(k == pl.num_programs(2) - 1)
    def _():
        o_ref[...] = (acc_ref[...] + b_ref[...]).astype(o_ref.dtype)


def linear(x2d, w_t, b_row, *, out_dtype=jnp.float32,
           tm_cap=256, tn_cap=512, tk_cap=512):
    M, K = x2d.shape
    Kw, N = w_t.shape
    assert Kw == K
    tm, Mp = _tile_and_pad(M, tm_cap, 128)
    tk, Kp = _tile_and_pad(K, tk_cap, 128)
    tn, Np = _tile_and_pad(N, tn_cap, 128)

    if (Mp, Kp) != (M, K):
        x2d = jnp.pad(x2d, ((0, Mp - M), (0, Kp - K)))
    if (Kp, Np) != (K, N):
        w_t = jnp.pad(w_t, ((0, Kp - K), (0, Np - N)))
    if Np != N:
        b_row = jnp.pad(b_row, ((0, 0), (0, Np - N)))

    grid = (Mp // tm, Np // tn, Kp // tk)
    out = pl.pallas_call(
        _linear_kernel,
        out_shape=jax.ShapeDtypeStruct((Mp, Np), out_dtype),
        grid=grid,
        in_specs=[
            pl.BlockSpec((tm, tk), lambda i, j, k: (i, k)),
            pl.BlockSpec((tk, tn), lambda i, j, k: (k, j)),
            pl.BlockSpec((1, tn), lambda i, j, k: (0, j)),
        ],
        out_specs=pl.BlockSpec((tm, tn), lambda i, j, k: (i, j)),
        scratch_shapes=[pltpu.VMEM((tm, tn), jnp.float32)],
        compiler_params=pltpu.CompilerParams(
            dimension_semantics=("parallel", "parallel", "arbitrary"),
            vmem_limit_bytes=32 * 1024 * 1024,
        ),
    )(x2d, w_t, b_row)
    if (Mp, Np) != (M, N):
        out = out[:M, :N]
    return out


# -----------------------------------------------------------------------------
# Kernel 2: multi-head attention, grid = (batch, head_group).
# The qkv activation columns were permuted (via the qkv weight rows) into
# head-group-major order: group g occupies columns [g*3*hg*hd, (g+1)*3*hg*hd)
# laid out as [q heads of g | k heads of g | v heads of g].  qk_scale is
# already folded into q.  Output is written directly in the final (B, P, D)
# layout (head h at columns [h*hd, (h+1)*hd)), one head at a time.
# TODO(synk): for long sequences (P >~ 1k on v7x) switch to a flash-style
# KV-tiled online softmax; fine as-is for ViT-scale P.
# -----------------------------------------------------------------------------
def _attn_kernel(qkv_ref, o_ref, *, heads_per_block, head_dim):
    hg, hd = heads_per_block, head_dim
    for h in range(hg):  # static, small (1-2 heads per block for ViT), unrolled
        q = qkv_ref[0, :, h * hd:(h + 1) * hd]                       # bf16 (P, hd)
        k = qkv_ref[0, :, (hg + h) * hd:(hg + h + 1) * hd]
        v = qkv_ref[0, :, (2 * hg + h) * hd:(2 * hg + h + 1) * hd]
        # NT contraction on the MXU (no explicit transpose of k); f32 scores.
        s = lax.dot_general(
            q, k, (((1,), (1,)), ((), ())), preferred_element_type=jnp.float32
        )                                                             # (P, P) f32
        m = jnp.max(s, axis=-1, keepdims=True)
        p = jnp.exp(s - m)                                            # f32 softmax path
        l = jnp.sum(p, axis=-1, keepdims=True)
        o = jnp.dot(p.astype(v.dtype), v, preferred_element_type=jnp.float32)
        # Store this head immediately: bounds live ranges, no concat/spills.
        o_ref[0, :, h * hd:(h + 1) * hd] = (
            o * pl.reciprocal(l, approx=True)
        ).astype(o_ref.dtype)


def mha_attention(qkv_bp3d, num_heads, head_dim, heads_per_block):
    B, P, threeD = qkv_bp3d.shape
    D = num_heads * head_dim
    assert threeD == 3 * D
    hg = heads_per_block
    G = num_heads // hg
    return pl.pallas_call(
        functools.partial(_attn_kernel, heads_per_block=hg, head_dim=head_dim),
        out_shape=jax.ShapeDtypeStruct((B, P, D), jnp.bfloat16),
        grid=(B, G),
        in_specs=[pl.BlockSpec((1, P, 3 * hg * head_dim),
                               lambda b, g: (b, 0, g))],
        out_specs=pl.BlockSpec((1, P, hg * head_dim), lambda b, g: (b, 0, g)),
        compiler_params=pltpu.CompilerParams(
            dimension_semantics=("parallel", "parallel"),
            vmem_limit_bytes=32 * 1024 * 1024,
        ),
    )(qkv_bp3d)


# -----------------------------------------------------------------------------
# One-time parameter re-layout:
#   * permute qkv weight rows so the GEMM output is head-group-major
#     ([q|k|v] per group of `hg` heads) -> the torch reshape/permute vanishes
#     and every attention grid step gets one contiguous column slab.
#   * fold qk_scale into the q rows (weight + bias).
#   * pre-transpose weights to (in, out) and cast them to bf16 (MXU-native,
#     half the weight DMA); biases stay f32 (added to the f32 accumulator).
# -----------------------------------------------------------------------------
def prepare_params(params, num_heads):
    w_qkv = params["w_qkv"].astype(jnp.float32)    # (3D, D) torch (out, in)
    b_qkv = params["b_qkv"].astype(jnp.float32)    # (3D,)
    w_proj = params["w_proj"].astype(jnp.float32)  # (D, D)
    b_proj = params["b_proj"].astype(jnp.float32)  # (D,)
    D = w_qkv.shape[1]
    hd = D // num_heads
    hg = _heads_per_block(num_heads, hd)

    # destination column t  ->  original torch qkv output column src(t)
    t = jnp.arange(3 * D)
    grp = 3 * hg * hd
    g = t // grp
    r = t % grp
    c = r // (hg * hd)                 # 0=q, 1=k, 2=v within the group
    r2 = r % (hg * hd)
    h = g * hg + r2 // hd              # global head
    d = r2 % hd
    src = c * D + d * num_heads + h    # torch split: col = c*D + d*heads + h

    w_qkv_r = jnp.take(w_qkv, src, axis=0)
    b_qkv_r = jnp.take(b_qkv, src, axis=0)

    # fold qk_scale into the q rows (exact in f32, removes in-kernel multiply)
    row_scale = jnp.where(c == 0, hd ** (-0.5), 1.0).astype(jnp.float32)
    w_qkv_r = w_qkv_r * row_scale[:, None]
    b_qkv_r = b_qkv_r * row_scale

    return {
        "heads_per_block": hg,
        "w_qkv_t": jnp.transpose(w_qkv_r).astype(jnp.bfloat16),  # (D, 3D)
        "b_qkv": b_qkv_r.reshape(1, 3 * D),                      # f32
        "w_proj_t": jnp.transpose(w_proj).astype(jnp.bfloat16),  # (D, D)
        "b_proj": b_proj.reshape(1, D),                          # f32
    }


# -----------------------------------------------------------------------------
# Full Attention forward (semantics identical to the PyTorch module)
# -----------------------------------------------------------------------------
def attention_forward(x, prepared, num_heads):
    B, P, D = x.shape
    hd = D // num_heads
    hg = prepared["heads_per_block"]

    # qkv GEMM -> bf16 intermediate (halves the HBM round-trip to attention)
    qkv = linear(x.reshape(B * P, D), prepared["w_qkv_t"], prepared["b_qkv"],
                 out_dtype=jnp.bfloat16)
    qkv = qkv.reshape(B, P, 3 * D)     # zero-cost reshape; no XLA transpose

    o = mha_attention(qkv, num_heads, hd, hg)          # (B, P, D) bf16

    out = linear(o.reshape(B * P, D), prepared["w_proj_t"], prepared["b_proj"],
                 out_dtype=jnp.float32)
    return out.reshape(B, P, D)


# -----------------------------------------------------------------------------
# Pure-JAX reference mirroring PyTorch semantics (raw torch-layout params).
# -----------------------------------------------------------------------------
def attention_reference(x, params, num_heads):
    B, P, D = x.shape
    hd = D // num_heads
    scale = hd ** (-0.5)
    qkv = x @ params["w_qkv"].T + params["b_qkv"]
    qkv = qkv.reshape(B, P, 3, hd, num_heads).transpose(2, 0, 4, 1, 3)
    q, k, v = qkv[0], qkv[1], qkv[2]
    atten = (q @ jnp.swapaxes(k, -2, -1)) * scale
    atten = jax.nn.softmax(atten, axis=-1)
    o = atten @ v
    o = jnp.swapaxes(o, -2, -3).reshape(B, P, D)
    return o @ params["w_proj"].T + params["b_proj"]


if __name__ == "__main__":
    # Small shapes consistent with the module: dim divisible by num_heads.
    B, P, D = 2, 8, 32
    num_heads = 4

    key = jax.random.PRNGKey(0)
    kx, k1, k2, k3, k4 = jax.random.split(key, 5)

    x = jax.random.normal(kx, (B, P, D), dtype=jnp.float32)
    params = {
        "w_qkv": 0.05 * jax.random.normal(k1, (3 * D, D), dtype=jnp.float32),
        "b_qkv": 0.01 * jax.random.normal(k2, (3 * D,), dtype=jnp.float32),
        "w_proj": 0.05 * jax.random.normal(k3, (D, D), dtype=jnp.float32),
        "b_proj": 0.01 * jax.random.normal(k4, (D,), dtype=jnp.float32),
    }

    prepared = prepare_params(params, num_heads)
    out = attention_forward(x, prepared, num_heads)
    out = jax.block_until_ready(out)

    ref = attention_reference(x, params, num_heads)
    assert out.shape == (B, P, D)
    # Tolerance relaxed vs f32: bf16 MXU operands + bf16 intermediates +
    # pl.reciprocal(approx=True); the softmax max/exp/sum path stays f32.
    assert jnp.allclose(out, ref, rtol=2e-2, atol=2e-2), "mismatch vs reference"

    print("KERNEL_OK")
</pallas_src>

<mosaic_0001>
module attributes {stable_mosaic.version = 11 : i64} {
  func.func @_linear_kernel(%arg0: i32, %arg1: i32, %arg2: i32, %arg3: memref<16x32xf32, #tpu.memory_space<vmem>>, %arg4: memref<32x96xbf16, #tpu.memory_space<vmem>>, %arg5: memref<1x96xf32, #tpu.memory_space<vmem>>, %arg6: memref<16x96xbf16, #tpu.memory_space<vmem>>, %arg7: memref<16x96xf32, #tpu.memory_space<vmem>>) attributes {dimension_semantics = [#tpu.dimension_semantics<parallel>, #tpu.dimension_semantics<parallel>, #tpu.dimension_semantics<arbitrary>], iteration_bounds = array<i64: 1, 1, 1>, scalar_prefetch = 0 : i64, scratch_operands = 1 : i64, tpu.core_type = #tpu.core_type<tc>, window_params = [{transform_indices = @transform_0, window_bounds = array<i64: 16, 32>}, {transform_indices = @transform_1, window_bounds = array<i64: 32, 96>}, {transform_indices = @transform_2, window_bounds = array<i64: 1, 96>}, {transform_indices = @transform_3, window_bounds = array<i64: 16, 96>}]} {
    %c0_i32 = arith.constant 0 : i32
    %0 = arith.cmpi eq, %arg2, %c0_i32 : i32
    %1 = arith.extui %0 : i1 to i32
    %c0_i32_0 = arith.constant 0 : i32
    %2 = arith.cmpi ne, %1, %c0_i32_0 : i32
    scf.if %2 {
      %cst_10 = arith.constant 0.000000e+00 : f32
      %13 = vector.broadcast %cst_10 : f32 to vector<16x96xf32>
      %c0_11 = arith.constant 0 : index
      %c0_12 = arith.constant 0 : index
      %14 = vector.load %arg7[%c0_11, %c0_12] : memref<16x96xf32, #tpu.memory_space<vmem>>, vector<16x96xf32>
      tpu.vector_store %arg7[%c0_11, %c0_12], %13 {strides = array<i32>} : memref<16x96xf32, #tpu.memory_space<vmem>>, vector<16x96xf32>,
    } else {
    }
    %c0 = arith.constant 0 : index
    %c0_1 = arith.constant 0 : index
    %3 = vector.load %arg7[%c0, %c0_1] : memref<16x96xf32, #tpu.memory_space<vmem>>, vector<16x96xf32>
    %c0_2 = arith.constant 0 : index
    %c0_3 = arith.constant 0 : index
    %4 = vector.load %arg3[%c0_2, %c0_3] : memref<16x32xf32, #tpu.memory_space<vmem>>, vector<16x32xf32>
    %5 = arith.truncf %4 : vector<16x32xf32> to vector<16x32xbf16>
    %c0_4 = arith.constant 0 : index
    %c0_5 = arith.constant 0 : index
    %6 = vector.load %arg4[%c0_4, %c0_5] : memref<32x96xbf16, #tpu.memory_space<vmem>>, vector<32x96xbf16>
    %cst = arith.constant dense<0.000000e+00> : vector<16x96xf32>
    %7 = tpu.matmul %5, %6, %cst {dimension_numbers = #tpu.dot_dimension_numbers<[1], [0], [0], [1], [0, 0, 1, 1], [], []>} : vector<16x32xbf16>, vector<32x96xbf16>, vector<16x96xf32> -> vector<16x96xf32>
    %8 = arith.addf %3, %7 : vector<16x96xf32>
    %c0_6 = arith.constant 0 : index
    %c0_7 = arith.constant 0 : index
    %9 = vector.load %arg7[%c0_6, %c0_7] : memref<16x96xf32, #tpu.memory_space<vmem>>, vector<16x96xf32>
    tpu.vector_store %arg7[%c0_6, %c0_7], %8 {strides = array<i32>} : memref<16x96xf32, #tpu.memory_space<vmem>>, vector<16x96xf32>,
    %c0_i32_8 = arith.constant 0 : i32
    %10 = arith.cmpi eq, %arg2, %c0_i32_8 : i32
    %11 = arith.extui %10 : i1 to i32
    %c0_i32_9 = arith.constant 0 : i32
    %12 = arith.cmpi ne, %11, %c0_i32_9 : i32
    scf.if %12 {
      %c0_10 = arith.constant 0 : index
      %c0_11 = arith.constant 0 : index
      %13 = vector.load %arg7[%c0_10, %c0_11] : memref<16x96xf32, #tpu.memory_space<vmem>>, vector<16x96xf32>
      %c0_12 = arith.constant 0 : index
      %c0_13 = arith.constant 0 : index
      %14 = vector.load %arg5[%c0_12, %c0_13] : memref<1x96xf32, #tpu.memory_space<vmem>>, vector<1x96xf32>
      %15 = vector.broadcast %14 : vector<1x96xf32> to vector<16x96xf32>
      %16 = arith.addf %13, %15 : vector<16x96xf32>
      %17 = arith.truncf %16 : vector<16x96xf32> to vector<16x96xbf16>
      %c0_14 = arith.constant 0 : index
      %c0_15 = arith.constant 0 : index
      %18 = vector.load %arg6[%c0_14, %c0_15] : memref<16x96xbf16, #tpu.memory_space<vmem>>, vector<16x96xbf16>
      tpu.vector_store %arg6[%c0_14, %c0_15], %17 {strides = array<i32>} : memref<16x96xbf16, #tpu.memory_space<vmem>>, vector<16x96xbf16>,
    } else {
    }
    return
  }
  func.func @transform_0(%arg0: i32, %arg1: i32, %arg2: i32) -> (i32, i32) {
    %c0_i32 = arith.constant 0 : i32
    return %arg0, %arg2 : i32, i32
  }
  func.func @transform_1(%arg0: i32, %arg1: i32, %arg2: i32) -> (i32, i32) {
    %c0_i32 = arith.constant 0 : i32
    return %arg2, %arg1 : i32, i32
  }
  func.func @transform_2(%arg0: i32, %arg1: i32, %arg2: i32) -> (i32, i32) {
    %c0_i32 = arith.constant 0 : i32
    %c0_i32_0 = arith.constant 0 : i32
    return %c0_i32, %arg1 : i32, i32
  }
  func.func @transform_3(%arg0: i32, %arg1: i32, %arg2: i32) -> (i32, i32) {
    %c0_i32 = arith.constant 0 : i32
    return %arg0, %arg1 : i32, i32
  }
}

</mosaic_0001>

<bundles_post_ra>
// kernel: tpu_custom_call.1
= control target key start
LH: loop header
LB: loop body
LE: loop exit
PB: predicated region body
PF: predicated region fallthrough
CT: control target
= control target key end

     0   :  { %8 = vsyncpa [#allocation4], 0  ;;  %s345_s0 = inlined_call_operand.hbm [shape: f32[16,32], index: 0, kind: input, shape index: {}]   ;;  %s346_s1 = inlined_call_operand.hbm [shape: bf16[32,96], index: 1, kind: input, shape index: {}]   ;;  %s347_s2 = inlined_call_operand.vmem [shape: f32[1,96], index: 2, kind: input, shape index: {}]   ;;  %s348_s3 = inlined_call_operand.hbm [shape: bf16[16,96], index: 3, kind: output, shape index: {}]  }
   0x1   :  { %9 = vsyncpa [#allocation7], 0 }
   0x2   :  { %10 = vsyncpa [#allocation5], 0  ;;  %s267_s12 = smov [#allocation3]   ;;  %s195_s16 = scalar_lea.hbm %s345_s0, 256 }
   0x3   :  { %s16_s13 = sshll.u32 %s267_s12, 4  ;;  %p196_p0 = scmp.ne.s32.totalorder %s345_s0, %s195_s16  ;;  %s17_s13 = int_to_ptr.vmem [resolvable:$true] %s16_s13 }
   0x4   :  { %p199_p1 = scmp.lt.u32.totalorder %s195_s16, %s345_s0 }
   0x6   :  { %p201_p2 = pnand %p199_p1, %p196_p0 }
   0x8   :  { %204 = shalt.err (!%p201_p2)
}
   0x9   :  { %s205_s21 = scalar_lea.vmem %s17_s13, 256  ;;  %p210_p4 = scmp.lt.s32.totalorder %s17_s13, %s17_s13 }
   0xa   :  { %p206_p3 = scmp.ne.s32.totalorder %s17_s13, %s205_s21  ;;  %p211_p5 = scmp.lt.s32.totalorder %s205_s21, %s205_s21 }
   0xc   :  { %p212_p6 = por %p211_p5, %p210_p4 }
   0xe   :  { %p213_p7 = pnand %p212_p6, %p206_p3 }
  0x10   :  { %216 = shalt.err (!%p213_p7)
}
  0x11   :  { %s268_s22 = smov 128   ;;  %s269_s23 = smov 8  }
  0x12   :  { %22 = dma.hbm_to_vmem [thread:$0]  %s345_s0, 256, %s17_s13, [#allocation4], %s268_s22, %s268_s22, %s269_s23  }
  0x13   :  { %s270_s26 = smov [#allocation6]   ;;  %s217_s30 = scalar_lea.hbm %s346_s1, 256 }
  0x14   :  { %s28_s27 = sshll.u32 %s270_s26, 4  ;;  %p218_p8 = scmp.ne.s32.totalorder %s346_s1, %s217_s30  ;;  %s29_s27 = int_to_ptr.vmem [resolvable:$true] %s28_s27 }
  0x15   :  { %p221_p9 = scmp.lt.u32.totalorder %s217_s30, %s346_s1 }
  0x17   :  { %p223_p10 = pnand %p221_p9, %p218_p8 }
  0x19   :  { %226 = shalt.err (!%p223_p10)
}
  0x1a   :  { %s227_s8 = scalar_lea.vmem %s29_s27, 256  ;;  %p232_p12 = scmp.lt.s32.totalorder %s29_s27, %s29_s27 }
  0x1b   :  { %p228_p11 = scmp.ne.s32.totalorder %s29_s27, %s227_s8  ;;  %p233_p13 = scmp.lt.s32.totalorder %s227_s8, %s227_s8 }
  0x1d   :  { %p234_p0 = por %p233_p13, %p232_p12 }
  0x1f   :  { %p235_p1 = pnand %p234_p0, %p228_p11 }
  0x21   :  { %238 = shalt.err (!%p235_p1)
}
  0x22   :  { %s271_s0 = smov 64   ;;  %s272_s9 = smov 4  }
  0x23   :  { %34 = dma.hbm_to_vmem [thread:$0]  %s346_s1, 256, %s29_s27, [#allocation7], %s271_s0, %s271_s0, %s272_s9  }
  0x24   :  { %261 = dma.done.wait [#allocation4], 256  }
  0x25   :  { %262 = vsyncadd [#allocation4], 4294967040 }
  0x26   :  { %263 = dma.done.wait [#allocation7], 256  }
  0x27   :  { %264 = vsyncadd [#allocation7], 4294967040  ;;  %vm48_vm0 = vcmask 785408   ;;  %v273_v0 = vmov 0.0   ;;  %vm274_vm1 = vmmov 0   ;;  %v193_v1 = vld [vmem:[#allocation6] sm:$0xff]  }
  0x28   :  { %49 = vst.msk [vmem:[#allocation2] sm:$0xff] %vm48_vm0, %v273_v0  ;;  %50 = vst.msk [vmem:[#allocation2 + $0x8] sm:$0xff] %vm48_vm0, %v273_v0  ;;  %176 = vmatprep.subr.bf16.mxu0 %v273_v0  ;;  %180 = vmatprep.mubr.msk.bf16.mxu0 %vm274_vm1, %v273_v0  ;;  %v194_v2 = vld [vmem:[#allocation6 + $0x8] sm:$0xff]   ;;  %v53_v3 = vld [vmem:[#allocation3] sm:$0xff]  ;;  %vm72_vm2 = vcmask 261120   ;;  %vm144_vm3 = vcmask 781312  }
  0x29   :  { %177 = vmatpush3.bf16.msra.mxu0 %v193_v1  ;;  %v54_v4 = vld [vmem:[#allocation3 + $0x8] sm:$0xff]  ;;  %v168_v14 = vld [vmem:[%s347_s2] ss:$0 sm:$0xff]  ;;  %s275_s13 = smov [#allocation8]  }
  0x2a   :  { %178 = vmatprep.subr.bf16.mxu0 %v273_v0  ;;  %v55_v5 = vpack.c.bf16 %v54_v4, %v53_v3  ;;  %s152_s14 = sshll.u32 %s275_s13, 4  ;;  %s153_s14 = int_to_ptr.vmem [resolvable:$true] %s152_s14 }
  0x2b   :  { %s239_s15 = scalar_lea.vmem %s153_s14, 128  ;;  %p244_p3 = scmp.lt.s32.totalorder %s153_s14, %s153_s14 }
  0x2c   :  { %p240_p2 = scmp.ne.s32.totalorder %s153_s14, %s239_s15  ;;  %p245_p4 = scmp.lt.s32.totalorder %s239_s15, %s239_s15 }
  0x2d   :  { %179 = vmatpush3.bf16.msra.mxu0 %v194_v2 }
  0x2e   :  { %p246_p5 = por %p245_p4, %p244_p3 }
  0x2f   :  { %v51_v6 = vld [vmem:[#allocation2] sm:$0xff]  ;;  %v52_v8 = vld [vmem:[#allocation2 + $0x8] sm:$0xff] }
  0x30   :  { %181 = vmatmul.mubr.msk.bf16.vlgmr.msra.gmra.mrb[0].mxu0 %vm72_vm2, %v55_v5  ;;  %p247_p6 = pnand %p246_p5, %p240_p2 }
 0x103   :  { %v110_v7 = vpop.f32.mrb[0].mxu0 }
 0x104   :  { %v117_v9 = vadd.f32 %v110_v7, %v51_v6  ;;  %v182_v10 = vpop.f32.mrb[1].mxu0 }
 0x105   :  { %v113_v11 = vpop.f32.mrb[2].mxu0 }
 0x106   :  { %120 = vst.msk [vmem:[#allocation2] sm:$0xff] %vm48_vm0, %v117_v9  ;;  %v118_v12 = vadd.f32 %v113_v11, %v52_v8  ;;  %v183_v13 = vpop.f32.mrb[3].mxu0 }
 0x108   :  { %121 = vst.msk [vmem:[#allocation2 + $0x8] sm:$0xff] %vm48_vm0, %v118_v12 }
 0x10d   :  { %v125_v15 = vld [vmem:[#allocation2] sm:$0xff] }
 0x10e   :  { %v134_v16 = vadd.f32 %v168_v14, %v125_v15 }
 0x10f   :  { %v126_v17 = vld [vmem:[#allocation2 + $0x8] sm:$0xff] }
 0x110   :  { %v135_v18 = vadd.f32 %v168_v14, %v126_v17  ;;  %v171_v19 = vpack.c.bf16 %v134_v16, %v134_v16 }
 0x112   :  { %v172_v20 = vpack.c.bf16 %v135_v18, %v135_v18  ;;  %145 = vst.msk [vmem:[#allocation8] sm:$0xf] %vm144_vm3, %v171_v19 }
 0x114   :  { %146 = vst.msk [vmem:[#allocation8 + $0x4] sm:$0xf] %vm144_vm3, %v172_v20 }
 0x115   :  { %250 = shalt.err (!%p247_p6)
}
 0x116   :  { %s251_s17 = scalar_lea.hbm %s348_s3, 128 }
 0x117   :  { %p252_p7 = scmp.ne.s32.totalorder %s348_s3, %s251_s17  ;;  %p255_p8 = scmp.lt.u32.totalorder %s251_s17, %s348_s3 }
 0x119   :  { %p257_p9 = pnand %p255_p8, %p252_p7 }
 0x11b   :  { %260 = shalt.err (!%p257_p9)
}
 0x11c   :  { %158 = dma.vmem_to_hbm [thread:$0]  %s153_s14, 128, %s348_s3, [#allocation5], %s271_s0, %s271_s0, %s272_s9  }
 0x11d   :  { %265 = dma.done.wait [#allocation5], 128  }
 0x11e   :  { %266 = vsyncadd [#allocation5], 4294967168 }
 0x11f   :  { %162 = vsyncpa [#allocation4], 1 }
 0x120   :  { %163 = vsyncpa [#allocation7], 1 }
 0x121   :  { %164 = vsyncpa [#allocation5], 1 }

</bundles_post_ra>
